<compile_context>
chip_gen: v6e
topology: v6e:2x2x1
jax: 0.10.0
libtpu: 0.0.40
codegen_flags: <defaults>
</compile_context>

<pallas_src>
import functools

import jax
import jax.numpy as jnp
from jax import lax
from jax.experimental import pallas as pl
from jax.experimental.pallas import tpu as pltpu


def _max_identity(dtype):
    """Identity element for max in `dtype` (-inf for floats, INT_MIN for ints)."""
    if jnp.issubdtype(dtype, jnp.floating):
        return jnp.array(-jnp.inf, dtype)
    return jnp.array(jnp.iinfo(dtype).min, dtype)


def _global_max_pool_kernel(x_ref, o_ref, *, num_hw, total_hw_blocks,
                            tail_valid, mask_tail):
    # x_ref: (1, TR, THW)   o_ref: (1, 1, TR)  (rows are lane-dense in the output)
    s = pl.program_id(0)
    hw = pl.program_id(2)

    @pl.when(hw == 0)
    def _init():
        o_ref[...] = jnp.full(o_ref.shape, _max_identity(o_ref.dtype),
                              dtype=o_ref.dtype)

    def _accumulate(x):
        # Reduce the lane (spatial) axis; (1, TR) is lane-dense in the rows.
        block_max = jnp.max(x, axis=-1)
        o_ref[...] = jnp.maximum(o_ref[...], block_max[:, None, :])

    if not mask_tail:
        # Fast path: every block is fully valid, no masking work at all.
        _accumulate(x_ref[...])
    else:
        # Only the single global tail block carries padding; every other block
        # takes the mask-free fast path (no per-step iota/compare/select).
        g = jnp.minimum(s * num_hw + hw, total_hw_blocks - 1)
        is_tail = g == total_hw_blocks - 1

        @pl.when(jnp.logical_not(is_tail))
        def _fast():
            _accumulate(x_ref[...])

        @pl.when(is_tail)
        def _tail():
            x = x_ref[...]
            # Lane-only iota (1, 1, THW) vs a static scalar bound.
            lane = lax.broadcasted_iota(jnp.int32, (1, 1, x.shape[-1]), 2)
            x = jnp.where(lane < tail_valid, x, _max_identity(x.dtype))
            _accumulate(x)


def _choose_tiles(R, HW, itemsize, block_bytes):
    # Row tile (sublane axis of the input / lane axis of the output): full R
    # when modest; otherwise the largest "nice" divisor to avoid a ragged,
    # revisited trailing row tile.
    if R <= 1024:
        tr = R
    else:
        for cand in (1024, 512, 384, 256, 128):
            if R % cand == 0:
                tr = cand
                break
        else:
            tr = 256
    # Spatial tile (lane axis of the input): a multiple of 128, sized so the
    # input block is roughly `block_bytes`; the full HW if that already fits.
    lanes = max(128, (block_bytes // max(1, tr * itemsize)) // 128 * 128)
    thw = HW if lanes >= HW else int(lanes)
    return int(tr), int(thw)


def global_max_pool2d(x: jax.Array, *, block_bytes: int = 8 << 20) -> jax.Array:
    """Global max pool over spatial dims of an NCHW tensor -> (N, C, 1, 1)."""
    N, C, H, W = x.shape
    HW = H * W
    R = N * C
    itemsize = jnp.dtype(x.dtype).itemsize

    # Fold N*C into the sublane axis and H*W into the lane axis.
    x3 = x.reshape(1, R, HW)

    tr, thw = _choose_tiles(R, HW, itemsize, block_bytes)
    num_r = pl.cdiv(R, tr)
    total_hw_blocks = pl.cdiv(HW, thw)
    tail_valid = HW - (total_hw_blocks - 1) * thw
    mask_tail = tail_valid != thw

    # Split the spatial reduction across a leading parallel axis so both v7x
    # TensorCores have work even when there is only one row tile.
    split = 2 if (num_r == 1 and total_hw_blocks >= 2) else 1
    num_hw = pl.cdiv(total_hw_blocks, split)

    # Explicit scoped-VMEM budget: double-buffered input + output blocks +
    # slack.  With the default 8 MiB input blocks this is ~20 MiB, safe on
    # v5e/v6e (128 MiB physical) and v7x (64 MiB physical).
    in_block_bytes = tr * thw * itemsize
    out_block_bytes = tr * itemsize
    vmem_bytes = 2 * in_block_bytes + 2 * out_block_bytes + (4 << 20)
    vmem_bytes = int(min(max(vmem_bytes, 8 << 20), 48 << 20))

    def in_index_map(s, r, hw):
        # Clamp: when the hw-block count is odd and split == 2, the final step
        # of the second half re-reads the last block — harmless (max is
        # idempotent, and the tail mask is keyed on the clamped index too).
        return (0, r, jnp.minimum(s * num_hw + hw, total_hw_blocks - 1))

    def out_index_map(s, r, hw):
        return (s, 0, r)

    kernel = functools.partial(
        _global_max_pool_kernel,
        num_hw=num_hw,
        total_hw_blocks=total_hw_blocks,
        tail_valid=tail_valid,
        mask_tail=mask_tail,
    )

    partial_max = pl.pallas_call(
        kernel,
        out_shape=jax.ShapeDtypeStruct((split, 1, R), x.dtype),
        grid=(split, num_r, num_hw),
        in_specs=[pl.BlockSpec((1, tr, thw), in_index_map)],
        out_specs=pl.BlockSpec((1, 1, tr), out_index_map),
        compiler_params=pltpu.CompilerParams(
            dimension_semantics=("parallel", "parallel", "arbitrary"),
            vmem_limit_bytes=vmem_bytes,
        ),
    )(x3)

    # Combine the split halves (no-op when split == 1) and restore NCHW.
    return jnp.max(partial_max, axis=0).reshape(N, C, 1, 1)


if __name__ == "__main__":
    key = jax.random.PRNGKey(0)

    def _check(x, **kw):
        out = jax.block_until_ready(global_max_pool2d(x, **kw))
        ref = jnp.max(x, axis=(2, 3), keepdims=True)
        assert out.shape == ref.shape, (out.shape, ref.shape)
        assert out.dtype == x.dtype, out.dtype
        assert jnp.allclose(out.astype(jnp.float32), ref.astype(jnp.float32)), \
            f"mismatch vs reference for shape {x.shape} dtype {x.dtype} kw {kw}"

    # 1) Primary check (matches the module's expected usage).
    x = jax.random.normal(key, (2, 4, 16, 16), dtype=jnp.float32)
    _check(x)

    # 2) Irregular (non-tile-aligned) spatial dims and N*C not a multiple of 8.
    _check(jax.random.normal(jax.random.PRNGKey(1), (2, 3, 7, 5), jnp.float32))

    # 3) Force small blocks -> exercises the split=2 path (even block count,
    #    no tail mask).
    _check(jax.random.normal(jax.random.PRNGKey(2), (2, 4, 16, 16), jnp.float32),
           block_bytes=4096)

    # 4) Force small blocks with an odd block count and a padded tail ->
    #    exercises the clamped duplicate block + tail-mask path.
    _check(jax.random.normal(jax.random.PRNGKey(3), (1, 4, 15, 20), jnp.float32),
           block_bytes=2048)

    # 5) bf16 input (native-dtype reduction path).
    _check(jax.random.normal(jax.random.PRNGKey(4), (2, 4, 16, 16), jnp.bfloat16))

    # 6) Ragged channel tiling (N*C > 1024 with no nice divisor) -> exercises
    #    the padded trailing row/output tile.
    _check(jax.random.normal(jax.random.PRNGKey(5), (1, 1030, 8, 8), jnp.float32))

    print("KERNEL_OK")
</pallas_src>

<mosaic_0001>
module attributes {stable_mosaic.version = 11 : i64} {
  func.func @_global_max_pool_kernel(%arg0: i32, %arg1: i32, %arg2: i32, %arg3: memref<1x8x256xf32, #tpu.memory_space<vmem>>, %arg4: memref<1x1x8xf32, #tpu.memory_space<vmem>>) attributes {dimension_semantics = [#tpu.dimension_semantics<parallel>, #tpu.dimension_semantics<parallel>, #tpu.dimension_semantics<arbitrary>], iteration_bounds = array<i64: 1, 1, 1>, scalar_prefetch = 0 : i64, scratch_operands = 0 : i64, tpu.core_type = #tpu.core_type<tc>, window_params = [{transform_indices = @transform_0, window_bounds = array<i64: 1, 8, 256>}, {transform_indices = @transform_1, window_bounds = array<i64: 1, 1, 8>}]} {
    %c0_i32 = arith.constant 0 : i32
    %0 = arith.cmpi eq, %arg2, %c0_i32 : i32
    %1 = arith.extui %0 : i1 to i32
    %c0_i32_0 = arith.constant 0 : i32
    %2 = arith.cmpi ne, %1, %c0_i32_0 : i32
    scf.if %2 {
      %cst_9 = arith.constant 0xFF800000 : f32
      %9 = vector.broadcast %cst_9 : f32 to vector<1x1x8xf32>
      %c0_10 = arith.constant 0 : index
      %c0_11 = arith.constant 0 : index
      %c0_12 = arith.constant 0 : index
      %10 = vector.load %arg4[%c0_10, %c0_11, %c0_12] : memref<1x1x8xf32, #tpu.memory_space<vmem>>, vector<1x1x8xf32>
      tpu.vector_store %arg4[%c0_10, %c0_11, %c0_12], %9 {strides = array<i32>} : memref<1x1x8xf32, #tpu.memory_space<vmem>>, vector<1x1x8xf32>,
    } else {
    }
    %c0 = arith.constant 0 : index
    %c0_1 = arith.constant 0 : index
    %c0_2 = arith.constant 0 : index
    %3 = vector.load %arg3[%c0, %c0_1, %c0_2] : memref<1x8x256xf32, #tpu.memory_space<vmem>>, vector<1x8x256xf32>
    %cst = arith.constant dense<0xFF800000> : vector<1x8xf32>
    %4 = vector.multi_reduction <maximumf>, %3, %cst [2] : vector<1x8x256xf32> to vector<1x8xf32>
    %c0_3 = arith.constant 0 : index
    %c0_4 = arith.constant 0 : index
    %c0_5 = arith.constant 0 : index
    %5 = vector.load %arg4[%c0_3, %c0_4, %c0_5] : memref<1x1x8xf32, #tpu.memory_space<vmem>>, vector<1x1x8xf32>
    %6 = vector.shape_cast %4 : vector<1x8xf32> to vector<1x1x8xf32>
    %7 = arith.maximumf %5, %6 : vector<1x1x8xf32>
    %c0_6 = arith.constant 0 : index
    %c0_7 = arith.constant 0 : index
    %c0_8 = arith.constant 0 : index
    %8 = vector.load %arg4[%c0_6, %c0_7, %c0_8] : memref<1x1x8xf32, #tpu.memory_space<vmem>>, vector<1x1x8xf32>
    tpu.vector_store %arg4[%c0_6, %c0_7, %c0_8], %7 {strides = array<i32>} : memref<1x1x8xf32, #tpu.memory_space<vmem>>, vector<1x1x8xf32>,
    return
  }
  func.func @transform_0(%arg0: i32, %arg1: i32, %arg2: i32) -> (i32, i32, i32) {
    %c1_i32 = arith.constant 1 : i32
    %0 = arith.muli %arg0, %c1_i32 : i32
    %1 = arith.addi %0, %arg2 : i32
    %c0_i32 = arith.constant 0 : i32
    %2 = arith.minsi %1, %c0_i32 : i32
    %c0_i32_0 = arith.constant 0 : i32
    %c0_i32_1 = arith.constant 0 : i32
    return %c0_i32_0, %arg1, %2 : i32, i32, i32
  }
  func.func @transform_1(%arg0: i32, %arg1: i32, %arg2: i32) -> (i32, i32, i32) {
    %c0_i32 = arith.constant 0 : i32
    %c0_i32_0 = arith.constant 0 : i32
    return %arg0, %c0_i32, %arg1 : i32, i32, i32
  }
}

</mosaic_0001>

<bundles_post_ra>
// kernel: tpu_custom_call.1
= control target key start
LH: loop header
LB: loop body
LE: loop exit
PB: predicated region body
PF: predicated region fallthrough
CT: control target
= control target key end

     0   :  { %6 = vsyncpa [#allocation3], 0  ;;  %s242_s0 = inlined_call_operand.hbm [shape: f32[1,8,256], index: 0, kind: input, shape index: {}]   ;;  %s243_s1 = inlined_call_operand.hbm [shape: f32[1,1,8], index: 1, kind: output, shape index: {}]  }
   0x1   :  { %7 = vsyncpa [#allocation4], 0  ;;  %s219_s6 = smov [#allocation2]  }
   0x2   :  { %s20_s7 = sshll.u32 %s219_s6, 4  ;;  %s21_s7 = int_to_ptr.vmem [resolvable:$true] %s20_s7 }
   0x3   :  { %s183_s8 = scalar_lea.vmem %s21_s7, 256  ;;  %p188_p1 = scmp.lt.s32.totalorder %s21_s7, %s21_s7 }
   0x4   :  { %p184_p0 = scmp.ne.s32.totalorder %s21_s7, %s183_s8  ;;  %p189_p2 = scmp.lt.s32.totalorder %s183_s8, %s183_s8 }
   0x6   :  { %p190_p3 = por %p189_p2, %p188_p1 }
   0x8   :  { %p191_p4 = pnand %p190_p3, %p184_p0 }
   0xa   :  { %194 = shalt.err (!%p191_p4)
}
   0xb   :  { %23 = dma.hbm_to_vmem [thread:$0]  %s242_s0, 256, %s21_s7, [#allocation3]  }
   0xc   :  { %215 = dma.done.wait [#allocation3], 256  }
   0xd   :  { %216 = vsyncadd [#allocation3], 4294967040  ;;  %vm35_vm0 = vcmask 57344   ;;  %v220_v0 = vmov -inf   ;;  %v37_v1 = vld [vmem:[#allocation2] sm:$0xff]  ;;  %v38_v2 = vld [vmem:[#allocation2 + $0x8] sm:$0xff]  ;;  %v44_v5 = vlaneseq }
   0xe   :  { %36 = vst.msk [vmem:[#allocation5] sm:$0x1] %vm35_vm0, %v220_v0  ;;  %v39_v3 = vmax.f32 %v37_v1, %v38_v2  ;;  %v221_v4 = vmov 0   ;;  %v222_v9 = vmov 1966171168   ;;  %s223_s0 = smov [#allocation5]  }
   0xf   :  { %174 = vset.pattern.permute.xlu0 %v221_v4  ;;  %v45_v6 = vshrl.u32 %v44_v5, 7  ;;  %v129_v7 = vand.u32 127, %v44_v5  ;;  %v81_v10 = vunpack.c.l.s4 %v222_v9  ;;  %s158_s11 = sshll.u32 %s223_s0, 4  ;;  %s159_s11 = int_to_ptr.vmem [resolvable:$true] %s158_s11 }
  0x10   :  { %40 = vmax.xlane.f32.xlu0 %v39_v3  ;;  %s195_s12 = scalar_lea.vmem %s159_s11, 16  ;;  %s199_s13 = scalar_lea.vmem %s159_s11, 32 }
  0x11   :  { %v132_v8 = vsub.s32 %v129_v7, %v45_v6  ;;  %v82_v11 = vunpack.c.0.s8 %v81_v10  ;;  %v46_v12 = vsub.s32 0, %v45_v6  ;;  %v50_v13 = vsub.s32 1, %v45_v6  ;;  %p196_p5 = scmp.ne.s32.totalorder %s159_s11, %s195_s12  ;;  %p200_p6 = scmp.lt.s32.totalorder %s159_s11, %s159_s11 }
  0x12   :  { %v54_v14 = vsub.s32 2, %v45_v6  ;;  %v58_v15 = vsub.s32 3, %v45_v6  ;;  %v62_v16 = vsub.s32 4, %v45_v6  ;;  %v66_v17 = vsub.s32 5, %v45_v6  ;;  %p201_p7 = scmp.lt.s32.totalorder %s199_s13, %s195_s12 }
  0x13   :  { %v70_v18 = vsub.s32 6, %v45_v6  ;;  %v74_v19 = vsub.s32 7, %v45_v6  ;;  %v85_v21 = vsub.s32 %v82_v11, %v45_v6 }
  0x14   :  { %p202_p8 = por %p201_p7, %p200_p6 }
  0x15   :  { %v42_v46 = vld [vmem:[#allocation5] sm:$0x1] }
  0x16   :  { %p203_p9 = pnand %p202_p8, %p196_p5 }
  0x99   :  { %v41_v20 = vpop.xlane.xlu0 %40 }
  0x9a   :  { %v47_v22 = vrot.slane %v41_v20, %v46_v12  ;;  %v51_v23 = vrot.slane %v41_v20, %v50_v13  ;;  %v55_v24 = vrot.slane %v41_v20, %v54_v14  ;;  %v59_v25 = vrot.slane %v41_v20, %v58_v15 }
  0x9b   :  { %v63_v26 = vrot.slane %v41_v20, %v62_v16  ;;  %v67_v27 = vrot.slane %v41_v20, %v66_v17  ;;  %v71_v28 = vrot.slane %v41_v20, %v70_v18  ;;  %v75_v29 = vrot.slane %v41_v20, %v74_v19 }
  0x9c   :  { %v76_v30 = vcombine.low %v47_v22, %v51_v23  ;;  %v77_v31 = vcombine.low %v55_v24, %v59_v25 }
  0x9d   :  { %v78_v32 = vcombine.low %v63_v26, %v67_v27  ;;  %v79_v33 = vcombine.low %v71_v28, %v75_v29 }
  0x9e   :  { %v86_v34 = vrot.slane %v76_v30, %v85_v21  ;;  %v93_v35 = vrot.slane %v77_v31, %v85_v21 }
  0x9f   :  { %v100_v36 = vrot.slane %v78_v32, %v85_v21  ;;  %v107_v37 = vrot.slane %v79_v33, %v85_v21 }
  0xa0   :  { %v108_v38 = vcombine.low %v86_v34, %v93_v35 }
  0xa1   :  { %v109_v39 = vcombine.low %v100_v36, %v107_v37 }
  0xa2   :  { %v116_v40 = vrot.slane %v108_v38, %v85_v21 }
  0xa3   :  { %v123_v41 = vrot.slane %v109_v39, %v85_v21 }
  0xa5   :  { %v124_v42 = vcombine.low %v116_v40, %v123_v41 }
  0xa7   :  { %126 = vperm.xlu0 %174, %v124_v42  }
 0x122   :  { %v127_v43 = vpop.permute.xlu0 %126 }
 0x123   :  { %v133_v44 = vrot.slane %v127_v43, %v132_v8 }
 0x125   :  { %v140_v45 = vrot.slane %v133_v44, %v85_v21 }
 0x127   :  { %v147_v47 = vrot.slane %v140_v45, %v85_v21 }
 0x129   :  { %v149_v48 = vmax.f32 %v42_v46, %v147_v47 }
 0x12b   :  { %151 = vst.msk [vmem:[#allocation5] sm:$0x1] %vm35_vm0, %v149_v48 }
 0x12c   :  { %206 = shalt.err (!%p203_p9)
}
 0x12d   :  { %161 = dma.vmem_to_hbm [thread:$0]  %s159_s11, 16, %s243_s1, [#allocation4]  }
 0x12e   :  { %217 = dma.done.wait [#allocation4], 16  }
 0x12f   :  { %218 = vsyncadd [#allocation4], 4294967280 }
 0x130   :  { %165 = vsyncpa [#allocation3], 1 }
 0x131   :  { %166 = vsyncpa [#allocation4], 1 }

</bundles_post_ra>
